<compile_context>
chip_gen: v7x
topology: tpu7x:2x2x1
jax: 0.10.0
libtpu: 0.0.40
codegen_flags: <defaults>
</compile_context>

<pallas_src>
import math

import numpy as np
import jax
import jax.numpy as jnp
from jax.experimental import pallas as pl
from jax.experimental.pallas import tpu as pltpu

_NEG = -1e30      # additive mask for off-block / padded logit columns
_ACT_CAP = 1e20   # finite clamp on hidden activations (guards inf*0 -> NaN in packed GEMMs)


def _packed_mlp_softmax_kernel(x_ref, w1_ref, b1_ref, w2_ref, w3_ref, mask_ref, o_ref):
    # x_ref   : (L*B, Din)  raw inputs, row r belongs to layer r // B
    # w1_ref  : (Din, C)    column-concatenated W1 blocks, zero-padded to C=128 lanes
    # b1_ref  : (1,  C)     concatenated b1, plus 1.0 at the homogeneous column
    # w2_ref  : (C,  C)     block-diagonal W2; b2 in the homogeneous row; 1.0 at (hc,hc)
    # w3_ref  : (C,  C)     block-diagonal W3; b3 in the homogeneous row
    # mask_ref: (L*B, C)    additive mask: 0 on the row's own T logit columns, -1e30 elsewhere
    # o_ref   : (L*B, C)    lane-dense output slab (row-block i / col-block i = layer i softmax)
    x = x_ref[...]

    # Layer 1: bias via VPU broadcast add (also creates the homogeneous-1 column
    # that carries b2/b3 through the next two GEMMs).  The finite clamp keeps
    # off-block activations from ever reaching inf, so the zero blocks of the
    # block-diagonal W2/W3 never produce inf*0 = NaN inside the MXU accumulation.
    h1 = jnp.minimum(jnp.maximum(
        jnp.dot(x, w1_ref[...], preferred_element_type=jnp.float32) + b1_ref[...],
        0.0), _ACT_CAP)
    h2 = jnp.minimum(jnp.maximum(
        jnp.dot(h1, w2_ref[...], preferred_element_type=jnp.float32),
        0.0), _ACT_CAP)
    logits = jnp.dot(h2, w3_ref[...], preferred_element_type=jnp.float32) + mask_ref[...]

    # Row-wise softmax: masked columns contribute exp(~-1e30 - m) == 0 exactly,
    # so each row normalizes only over its own layer's num_tasks logits.
    m = jnp.max(logits, axis=-1, keepdims=True)
    e = jnp.exp(logits - m)
    s = jnp.sum(e, axis=-1, keepdims=True)
    r = pl.reciprocal(s, approx=True)   # EUP vrcp (otherwise-idle slot)
    r = r * (2.0 - s * r)               # one Newton step -> ~full f32 accuracy
    o_ref[...] = (e * r).astype(o_ref.dtype)


def pack_params(params, batch, packed_width=128):
    """Fold per-layer weights/biases into (8,128)-aligned packed operands. Done once."""
    w1, b1 = params["w1"], params["b1"]   # (L, Din, H), (L, 1, H)
    w2, b2 = params["w2"], params["b2"]   # (L, H, H),   (L, 1, H)
    w3, b3 = params["w3"], params["b3"]   # (L, H, T),   (L, 1, T)
    L, din, h = w1.shape
    t = w3.shape[-1]
    lh, lt = L * h, L * t
    C = packed_width

    # NOTE(scaling): the packed block-diagonal W2/W3 GEMMs do L x redundant MACs
    # and the W2 footprint grows as (L*H)^2 * 4 B.  Re-derive VMEM headroom
    # against v7x (64 MiB physical / 32 MiB default scoped), NOT v5e/v6e's
    # 128 MiB: e.g. L=8, H=512 already needs W2 tiling + vmem_limit_bytes on
    # v7x.  Once L*H reaches a few hundred, switch back to a per-layer grid
    # (marked "parallel" so v7x's 2 TCs can shard it) or a batched einsum.
    # NOTE(throughput): at M = L*B = 24 rows the MXU is <10% utilized on
    # v6e/v7x; the kernel is launch-overhead bound.  If throughput matters,
    # batch several independent predictor calls into one pallas_call (rows
    # stacked to >=128/256) rather than tuning this single call.
    if lh + 1 > C or lt > C:
        raise ValueError("packed_width too small for L*H+1 / L*T; raise it "
                         "(multiple of 128) or use the per-layer grid form")
    hc = lh  # homogeneous-1 column/row used to fold b2/b3 into W2/W3

    w1p = jnp.zeros((din, C), jnp.float32)
    w2p = jnp.zeros((C, C), jnp.float32)
    w3p = jnp.zeros((C, C), jnp.float32)
    for i in range(L):
        w1p = w1p.at[:, i * h:(i + 1) * h].set(w1[i])
        w2p = w2p.at[i * h:(i + 1) * h, i * h:(i + 1) * h].set(w2[i])
        w3p = w3p.at[i * h:(i + 1) * h, i * t:(i + 1) * t].set(w3[i])
    b1p = (jnp.zeros((1, C), jnp.float32)
              .at[0, :lh].set(b1.reshape(lh))
              .at[0, hc].set(1.0))                       # regenerates the ones column
    w2p = w2p.at[hc, :lh].set(b2.reshape(lh)).at[hc, hc].set(1.0)
    w3p = w3p.at[hc, :lt].set(b3.reshape(lt))

    # Trace-time constant additive block mask (no iota / div / cmp in-kernel).
    # Row r (layer r // batch) keeps only its own T logit columns; the padded
    # columns >= L*T stay masked so they add exp(...) = 0 to every row sum.
    row_layer = np.arange(L * batch)[:, None] // batch
    col = np.arange(C)[None, :]
    keep = (col < lt) & ((col // t) == row_layer)
    mask = jnp.asarray(np.where(keep, 0.0, _NEG).astype(np.float32))

    return {"w1p": w1p, "b1p": b1p, "w2p": w2p, "w3p": w3p, "mask": mask}


def layerwise_alpha_predictor(x, packed, num_tasks):
    """x: (L, B, Din) f32; packed: pack_params() output. Returns (L, B, num_tasks)."""
    L, B, din = x.shape
    t = num_tasks
    lb = L * B
    C = packed["w3p"].shape[-1]

    # Free contiguous view — no per-call concat / extra HBM round trip for x.
    x2d = x.reshape(lb, din)

    packed_out = pl.pallas_call(
        _packed_mlp_softmax_kernel,
        out_shape=jax.ShapeDtypeStruct((lb, C), jnp.float32),
        # Gridless single invocation: whole-array operands resident in VMEM,
        # no auto-pipeline buffers or DMA bookkeeping for a 1-step loop.
        in_specs=[pl.BlockSpec(memory_space=pltpu.MemorySpace.VMEM)
                  for _ in range(6)],
        out_specs=pl.BlockSpec(memory_space=pltpu.MemorySpace.VMEM),
    )(x2d, packed["w1p"], packed["b1p"], packed["w2p"], packed["w3p"],
      packed["mask"])

    # Single advanced-index gather pulls out each layer's diagonal block.
    y = packed_out[:, :L * t].reshape(L, B, L, t)
    idx = jnp.arange(L)
    return y[idx, :, idx, :]


def _xavier_uniform(key, fan_in, fan_out, shape):
    bound = math.sqrt(6.0 / (fan_in + fan_out))
    return jax.random.uniform(key, shape, dtype=jnp.float32,
                              minval=-bound, maxval=bound)


def init_params(key, num_layers, input_dim, hidden_dim, num_tasks):
    k1, k2, k3 = jax.random.split(key, 3)
    # Xavier-uniform weights (bound symmetric in fan_in/fan_out, so [in, out]
    # storage matches PyTorch's [out, in] init); zero biases, as in the module.
    return {
        "w1": _xavier_uniform(k1, input_dim, hidden_dim,
                              (num_layers, input_dim, hidden_dim)),
        "b1": jnp.zeros((num_layers, 1, hidden_dim), jnp.float32),
        "w2": _xavier_uniform(k2, hidden_dim, hidden_dim,
                              (num_layers, hidden_dim, hidden_dim)),
        "b2": jnp.zeros((num_layers, 1, hidden_dim), jnp.float32),
        "w3": _xavier_uniform(k3, hidden_dim, num_tasks,
                              (num_layers, hidden_dim, num_tasks)),
        "b3": jnp.zeros((num_layers, 1, num_tasks), jnp.float32),
    }


def reference_forward(x, p):
    def one(i):
        h1 = jax.nn.relu(x[i] @ p["w1"][i] + p["b1"][i])
        h2 = jax.nn.relu(h1 @ p["w2"][i] + p["b2"][i])
        return jax.nn.softmax(h2 @ p["w3"][i] + p["b3"][i], axis=-1)
    return jnp.stack([one(i) for i in range(x.shape[0])], axis=0)


if __name__ == "__main__":
    num_layers = 3
    batch = 8
    input_dim = 32
    hidden_dim = 32
    num_additional_tasks = 4

    key = jax.random.PRNGKey(0)
    kx, kp = jax.random.split(key)

    x = jax.random.normal(kx, (num_layers, batch, input_dim), dtype=jnp.float32)
    params = init_params(kp, num_layers, input_dim, hidden_dim,
                         num_additional_tasks)
    packed = jax.tree_util.tree_map(jax.block_until_ready,
                                    pack_params(params, batch))

    fwd = jax.jit(layerwise_alpha_predictor, static_argnums=(2,))
    out = jax.block_until_ready(fwd(x, packed, num_additional_tasks))

    ref = reference_forward(x, params)
    assert out.shape == (num_layers, batch, num_additional_tasks)
    # Tolerance slightly relaxed vs. 1e-5 to leave margin for the Newton-refined
    # approx reciprocal and packed-GEMM accumulation-order effects.
    assert jnp.allclose(out, ref, atol=1e-4, rtol=1e-4), \
        float(jnp.max(jnp.abs(out - ref)))
    # Rows should still sum to ~1 (padded/off-block softmax entries are exact zeros).
    assert jnp.allclose(jnp.sum(out, axis=-1), 1.0, atol=1e-4)

    print("KERNEL_OK")
</pallas_src>

<mosaic_0001>
module attributes {stable_mosaic.version = 11 : i64} {
  func.func @_packed_mlp_softmax_kernel(%arg0: memref<24x32xf32, #tpu.memory_space<vmem>>, %arg1: memref<32x128xf32, #tpu.memory_space<vmem>>, %arg2: memref<1x128xf32, #tpu.memory_space<vmem>>, %arg3: memref<128x128xf32, #tpu.memory_space<vmem>>, %arg4: memref<128x128xf32, #tpu.memory_space<vmem>>, %arg5: memref<24x128xf32, #tpu.memory_space<vmem>>, %arg6: memref<24x128xf32, #tpu.memory_space<vmem>>) attributes {dimension_semantics = [], scalar_prefetch = 0 : i64, scratch_operands = 0 : i64, tpu.core_type = #tpu.core_type<tc>} {
    %c0 = arith.constant 0 : index
    %c0_0 = arith.constant 0 : index
    %0 = vector.load %arg0[%c0, %c0_0] : memref<24x32xf32, #tpu.memory_space<vmem>>, vector<24x32xf32>
    %c0_1 = arith.constant 0 : index
    %c0_2 = arith.constant 0 : index
    %1 = vector.load %arg1[%c0_1, %c0_2] : memref<32x128xf32, #tpu.memory_space<vmem>>, vector<32x128xf32>
    %cst = arith.constant dense<0.000000e+00> : vector<24x128xf32>
    %2 = tpu.matmul %0, %1, %cst {dimension_numbers = #tpu.dot_dimension_numbers<[1], [0], [0], [1], [0, 0, 1, 1], [], []>} : vector<24x32xf32>, vector<32x128xf32>, vector<24x128xf32> -> vector<24x128xf32>
    %c0_3 = arith.constant 0 : index
    %c0_4 = arith.constant 0 : index
    %3 = vector.load %arg2[%c0_3, %c0_4] : memref<1x128xf32, #tpu.memory_space<vmem>>, vector<1x128xf32>
    %4 = vector.broadcast %3 : vector<1x128xf32> to vector<24x128xf32>
    %5 = arith.addf %2, %4 : vector<24x128xf32>
    %cst_5 = arith.constant 0.000000e+00 : f32
    %6 = vector.broadcast %cst_5 : f32 to vector<24x128xf32>
    %7 = arith.maximumf %5, %6 : vector<24x128xf32>
    %cst_6 = arith.constant 1.000000e+20 : f32
    %8 = vector.broadcast %cst_6 : f32 to vector<24x128xf32>
    %9 = arith.minimumf %7, %8 : vector<24x128xf32>
    %c0_7 = arith.constant 0 : index
    %c0_8 = arith.constant 0 : index
    %10 = vector.load %arg3[%c0_7, %c0_8] : memref<128x128xf32, #tpu.memory_space<vmem>>, vector<128x128xf32>
    %cst_9 = arith.constant dense<0.000000e+00> : vector<24x128xf32>
    %11 = tpu.matmul %9, %10, %cst_9 {dimension_numbers = #tpu.dot_dimension_numbers<[1], [0], [0], [1], [0, 0, 1, 1], [], []>} : vector<24x128xf32>, vector<128x128xf32>, vector<24x128xf32> -> vector<24x128xf32>
    %cst_10 = arith.constant 0.000000e+00 : f32
    %12 = vector.broadcast %cst_10 : f32 to vector<24x128xf32>
    %13 = arith.maximumf %11, %12 : vector<24x128xf32>
    %cst_11 = arith.constant 1.000000e+20 : f32
    %14 = vector.broadcast %cst_11 : f32 to vector<24x128xf32>
    %15 = arith.minimumf %13, %14 : vector<24x128xf32>
    %c0_12 = arith.constant 0 : index
    %c0_13 = arith.constant 0 : index
    %16 = vector.load %arg4[%c0_12, %c0_13] : memref<128x128xf32, #tpu.memory_space<vmem>>, vector<128x128xf32>
    %cst_14 = arith.constant dense<0.000000e+00> : vector<24x128xf32>
    %17 = tpu.matmul %15, %16, %cst_14 {dimension_numbers = #tpu.dot_dimension_numbers<[1], [0], [0], [1], [0, 0, 1, 1], [], []>} : vector<24x128xf32>, vector<128x128xf32>, vector<24x128xf32> -> vector<24x128xf32>
    %c0_15 = arith.constant 0 : index
    %c0_16 = arith.constant 0 : index
    %18 = vector.load %arg5[%c0_15, %c0_16] : memref<24x128xf32, #tpu.memory_space<vmem>>, vector<24x128xf32>
    %19 = arith.addf %17, %18 : vector<24x128xf32>
    %cst_17 = arith.constant dense<0xFF800000> : vector<24xf32>
    %20 = vector.multi_reduction <maximumf>, %19, %cst_17 [1] : vector<24x128xf32> to vector<24xf32>
    %21 = vector.shape_cast %20 : vector<24xf32> to vector<24x1xf32>
    %22 = vector.broadcast %21 : vector<24x1xf32> to vector<24x128xf32>
    %23 = arith.subf %19, %22 : vector<24x128xf32>
    %24 = math.exp %23 : vector<24x128xf32>
    %cst_18 = arith.constant dense<0.000000e+00> : vector<24xf32>
    %25 = vector.multi_reduction <add>, %24, %cst_18 [1] : vector<24x128xf32> to vector<24xf32>
    %26 = vector.shape_cast %25 : vector<24xf32> to vector<24x1xf32>
    %27 = tpu.reciprocal %26 {approx = true} : vector<24x1xf32> -> vector<24x1xf32>
    %28 = arith.mulf %26, %27 : vector<24x1xf32>
    %cst_19 = arith.constant 2.000000e+00 : f32
    %29 = vector.broadcast %cst_19 : f32 to vector<24x1xf32>
    %30 = arith.subf %29, %28 : vector<24x1xf32>
    %31 = arith.mulf %27, %30 : vector<24x1xf32>
    %32 = vector.broadcast %31 : vector<24x1xf32> to vector<24x128xf32>
    %33 = arith.mulf %24, %32 : vector<24x128xf32>
    %c0_20 = arith.constant 0 : index
    %c0_21 = arith.constant 0 : index
    %34 = vector.load %arg6[%c0_20, %c0_21] : memref<24x128xf32, #tpu.memory_space<vmem>>, vector<24x128xf32>
    tpu.vector_store %arg6[%c0_20, %c0_21], %33 {strides = array<i32>} : memref<24x128xf32, #tpu.memory_space<vmem>>, vector<24x128xf32>,
    return
  }
}

</mosaic_0001>

<bundles_post_ra>
// kernel: layerwise_alpha_predictor.1
= control target key start
LH: loop header
LB: loop body
LE: loop exit
PB: predicated region body
PF: predicated region fallthrough
CT: control target
= control target key end

     0   :  { %11 = vsyncpa [#allocation3], 0  ;;  %s973_s0 = inlined_call_operand.hbm [shape: f32[24,32], index: 0, kind: input, shape index: {}]   ;;  %s974_s1 = inlined_call_operand.hbm [shape: f32[32,128], index: 1, kind: input, shape index: {}]   ;;  %s975_s2 = inlined_call_operand.vmem [shape: f32[1,128], index: 2, kind: input, shape index: {}]   ;;  %s976_s3 = inlined_call_operand.hbm [shape: f32[128,128], index: 3, kind: input, shape index: {}]   ;;  %s977_s4 = inlined_call_operand.hbm [shape: f32[128,128], index: 4, kind: input, shape index: {}]   ;;  %s978_s5 = inlined_call_operand.hbm [shape: f32[24,128], index: 5, kind: input, shape index: {}]   ;;  %s979_s6 = inlined_call_operand.vmem [shape: f32[24,128], index: 6, kind: output, shape index: {}]  }
   0x1   :  { %12 = vsyncpa [#allocation5], 0 }
   0x2   :  { %13 = vsyncpa [#allocation8], 0  ;;  %s788_s21 = smov [#allocation4]   ;;  %s789_s23 = smov [#allocation7]  }
   0x3   :  { %s31_s22 = sshll.u32 %s788_s21, 4  ;;  %s57_s24 = sshll.u32 %s789_s23, 4  ;;  %s32_s22 = int_to_ptr.vmem [resolvable:$true] %s31_s22  ;;  %s833_s24 = int_to_ptr.vmem [resolvable:$true] %s57_s24 }
   0x4   :  { %s672_s27 = scalar_lea.hbm %s974_s1, 512 }
   0x5   :  { %p673_p0 = scmp.ne.s32.totalorder %s974_s1, %s672_s27  ;;  %p676_p1 = scmp.lt.u32.totalorder %s672_s27, %s974_s1 }
   0x7   :  { %p678_p2 = pnand %p676_p1, %p673_p0 }
   0x9   :  { %681 = shalt.err (!%p678_p2)
}
   0xa   :  { %s682_s8 = scalar_lea.vmem %s32_s22, 512  ;;  %p687_p4 = scmp.lt.s32.totalorder %s32_s22, %s32_s22 }
   0xb   :  { %p683_p3 = scmp.ne.s32.totalorder %s32_s22, %s682_s8  ;;  %p688_p5 = scmp.lt.s32.totalorder %s682_s8, %s682_s8 }
   0xd   :  { %p689_p6 = por %p688_p5, %p687_p4 }
   0xf   :  { %p690_p7 = pnand %p689_p6, %p683_p3 }
  0x11   :  { %693 = shalt.err (!%p690_p7)
}
  0x12   :  { %s790_s9 = smov 128   ;;  %s791_s10 = smov 8  }
  0x13   :  { %37 = dma.hbm_to_vmem [thread:$0]  %s974_s1, 512, %s32_s22, [#allocation5], %s790_s9, %s790_s9, %s791_s10  }
  0x14   :  { %s694_s15 = scalar_lea.hbm %s977_s4, 2048 }
  0x15   :  { %p695_p8 = scmp.ne.s32.totalorder %s977_s4, %s694_s15  ;;  %p698_p9 = scmp.lt.u32.totalorder %s694_s15, %s977_s4 }
  0x17   :  { %p700_p10 = pnand %p698_p9, %p695_p8 }
  0x19   :  { %703 = shalt.err (!%p700_p10)
}
  0x1a   :  { %s704_s20 = scalar_lea.vmem %s833_s24, 2048  ;;  %p709_p12 = scmp.lt.s32.totalorder %s833_s24, %s833_s24 }
  0x1b   :  { %p705_p11 = scmp.ne.s32.totalorder %s833_s24, %s704_s20  ;;  %p710_p13 = scmp.lt.s32.totalorder %s704_s20, %s704_s20 }
  0x1d   :  { %p711_p0 = por %p710_p13, %p709_p12 }
  0x1f   :  { %p712_p1 = pnand %p711_p0, %p705_p11 }
  0x21   :  { %715 = shalt.err (!%p712_p1)
}
  0x22   :  { %63 = dma.hbm_to_vmem [thread:$0]  %s977_s4, 2048, %s833_s24, [#allocation8], %s790_s9, %s790_s9, %s791_s10  }
  0x23   :  { %s792_s22 = smov [#allocation2]   ;;  %s793_s25 = smov [#allocation6]  }
  0x24   :  { %s19_s23 = sshll.u32 %s792_s22, 4  ;;  %s45_s26 = sshll.u32 %s793_s25, 4  ;;  %s20_s23 = int_to_ptr.vmem [resolvable:$true] %s19_s23  ;;  %s870_s26 = int_to_ptr.vmem [resolvable:$true] %s45_s26 }
  0x25   :  { %s716_s29 = scalar_lea.hbm %s973_s0, 384 }
  0x26   :  { %p717_p2 = scmp.ne.s32.totalorder %s973_s0, %s716_s29  ;;  %p720_p3 = scmp.lt.u32.totalorder %s716_s29, %s973_s0 }
  0x28   :  { %p722_p4 = pnand %p720_p3, %p717_p2 }
  0x2a   :  { %725 = shalt.err (!%p722_p4)
}
  0x2b   :  { %s726_s4 = scalar_lea.vmem %s20_s23, 384  ;;  %p731_p6 = scmp.lt.s32.totalorder %s20_s23, %s20_s23 }
  0x2c   :  { %p727_p5 = scmp.ne.s32.totalorder %s20_s23, %s726_s4  ;;  %p732_p7 = scmp.lt.s32.totalorder %s726_s4, %s726_s4 }
  0x2e   :  { %p733_p8 = por %p732_p7, %p731_p6 }
  0x30   :  { %p734_p9 = pnand %p733_p8, %p727_p5 }
  0x32   :  { %737 = shalt.err (!%p734_p9)
}
  0x33   :  { %25 = dma.hbm_to_vmem [thread:$0]  %s973_s0, 384, %s20_s23, [#allocation3], %s790_s9, %s790_s9, %s791_s10  }
  0x34   :  { %s738_s15 = scalar_lea.hbm %s976_s3, 2048 }
  0x35   :  { %p739_p10 = scmp.ne.s32.totalorder %s976_s3, %s738_s15  ;;  %p742_p11 = scmp.lt.u32.totalorder %s738_s15, %s976_s3 }
  0x37   :  { %p744_p12 = pnand %p742_p11, %p739_p10 }
  0x39   :  { %747 = shalt.err (!%p744_p12)
}
  0x3a   :  { %s748_s20 = scalar_lea.vmem %s870_s26, 2048  ;;  %p753_p0 = scmp.lt.s32.totalorder %s870_s26, %s870_s26 }
  0x3b   :  { %p749_p13 = scmp.ne.s32.totalorder %s870_s26, %s748_s20  ;;  %p754_p1 = scmp.lt.s32.totalorder %s748_s20, %s748_s20 }
  0x3d   :  { %p755_p2 = por %p754_p1, %p753_p0 }
  0x3f   :  { %p756_p3 = pnand %p755_p2, %p749_p13 }
  0x41   :  { %759 = shalt.err (!%p756_p3)
}
  0x42   :  { %51 = dma.hbm_to_vmem [thread:$0]  %s976_s3, 2048, %s870_s26, [#allocation5], %s790_s9, %s790_s9, %s791_s10  }
  0x43   :  { %s794_s21 = smov [#allocation9]   ;;  %s760_s27 = scalar_lea.hbm %s978_s5, 384 }
  0x44   :  { %s69_s22 = sshll.u32 %s794_s21, 4  ;;  %p761_p4 = scmp.ne.s32.totalorder %s978_s5, %s760_s27  ;;  %s70_s22 = int_to_ptr.vmem [resolvable:$true] %s69_s22 }
  0x45   :  { %p764_p5 = scmp.lt.u32.totalorder %s760_s27, %s978_s5 }
  0x47   :  { %p766_p6 = pnand %p764_p5, %p761_p4 }
  0x49   :  { %769 = shalt.err (!%p766_p6)
}
  0x4a   :  { %s770_s8 = scalar_lea.vmem %s70_s22, 384  ;;  %p775_p8 = scmp.lt.s32.totalorder %s70_s22, %s70_s22 }
  0x4b   :  { %p771_p7 = scmp.ne.s32.totalorder %s70_s22, %s770_s8  ;;  %p776_p9 = scmp.lt.s32.totalorder %s770_s8, %s770_s8 }
  0x4d   :  { %p777_p10 = por %p776_p9, %p775_p8 }
  0x4f   :  { %p778_p11 = pnand %p777_p10, %p771_p7 }
  0x51   :  { %781 = shalt.err (!%p778_p11)
}
  0x52   :  { %75 = dma.hbm_to_vmem [thread:$0]  %s978_s5, 384, %s70_s22, [#allocation8], %s790_s9, %s790_s9, %s791_s10  }
  0x53   :  { %782 = dma.done.wait [#allocation3], 384  }
  0x54   :  { %783 = vsyncadd [#allocation3], 4294966912 }
  0x55   :  { %784 = dma.done.wait [#allocation5], 2560  }
  0x56   :  { %785 = vsyncadd [#allocation5], 4294964736 }
  0x57   :  { %786 = dma.done.wait [#allocation8], 2432  }
  0x58   :  { %787 = vsyncadd [#allocation8], 4294964864  ;;  %v795_v0 = vmov 0.0|0.0   ;;  %vm796_vm0 = vmmov 0   ;;  %v797_v1 = vmov 0.0   ;;  %v94_v2 = vld [vmem:[#allocation4] sm:$0xff] }
  0x59   :  { %596 = vmatprep.subr.bf16.mxu0 %v795_v0  ;;  %505 = vmatprep.mubr.msk.f32.mxu0 %vm796_vm0, %v797_v1  ;;  %v95_v3 = vld [vmem:[#allocation4 + $0x8] sm:$0xff]  ;;  %v96_v4 = vld [vmem:[#allocation4 + $0x10] sm:$0xff]  ;;  %v97_v6 = vld [vmem:[#allocation4 + $0x18] sm:$0xff]  ;;  %vm105_vm1 = vcmask 261120  }
  0x5a   :  { %602 = vmatprep.subr.bf16.mxu1 %v795_v0  ;;  %546 = vmatprep.mubr.msk.f32.mxu1 %vm796_vm0, %v797_v1  ;;  %v597_v5 = vpack.c.bf16 %v95_v3, %v94_v2  ;;  %v201_v7 = vld [vmem:[#allocation6] sm:$0xff]  ;;  %v202_v8 = vld [vmem:[#allocation6 + $0x8] sm:$0xff]  ;;  %v600_v9 = vpack.c.bf16 %v97_v6, %v96_v4  ;;  %v203_v11 = vld [vmem:[#allocation6 + $0x10] sm:$0xff] }
  0x5b   :  { %v603_v10 = vpack.c.bf16 %v202_v8, %v201_v7  ;;  %v204_v12 = vld [vmem:[#allocation6 + $0x18] sm:$0xff]  ;;  %v205_v14 = vld [vmem:[#allocation6 + $0x20] sm:$0xff]  ;;  %v206_v15 = vld [vmem:[#allocation6 + $0x28] sm:$0xff] }
  0x5c   :  { %598 = vmatpush3.bf16.msra.mxu0 %v597_v5  ;;  %v606_v13 = vpack.c.bf16 %v204_v12, %v203_v11  ;;  %v91_v16 = vld [vmem:[#allocation2] sm:$0xff]  ;;  %v609_v17 = vpack.c.bf16 %v206_v15, %v205_v14  ;;  %v207_v18 = vld [vmem:[#allocation6 + $0x30] sm:$0xff]  ;;  %v208_v19 = vld [vmem:[#allocation6 + $0x38] sm:$0xff] }
  0x5d   :  { %599 = vmatprep.subr.bf16.mxu0 %v795_v0  ;;  %604 = vmatpush3.bf16.msra.mxu1 %v603_v10  ;;  %v92_v20 = vld [vmem:[#allocation2 + $0x8] sm:$0xff]  ;;  %v612_v21 = vpack.c.bf16 %v208_v19, %v207_v18  ;;  %v209_v22 = vld [vmem:[#allocation6 + $0x40] sm:$0xff]  ;;  %v210_v23 = vld [vmem:[#allocation6 + $0x48] sm:$0xff] }
  0x5e   :  { %605 = vmatprep.subr.bf16.mxu1 %v795_v0  ;;  %v93_v24 = vld [vmem:[#allocation2 + $0x10] sm:$0xff]  ;;  %v615_v25 = vpack.c.bf16 %v210_v23, %v209_v22  ;;  %v211_v26 = vld [vmem:[#allocation6 + $0x50] sm:$0xff]  ;;  %v213_v29 = vld [vmem:[#allocation6 + $0x60] sm:$0xff] }
  0x5f   :  { %v212_v27 = vld [vmem:[#allocation6 + $0x58] sm:$0xff]  ;;  %v214_v30 = vld [vmem:[#allocation6 + $0x68] sm:$0xff]  ;;  %v215_v32 = vld [vmem:[#allocation6 + $0x70] sm:$0xff] }
  0x60   :  { %601 = vmatpush3.bf16.msra.mxu0 %v600_v9  ;;  %v618_v28 = vpack.c.bf16 %v212_v27, %v211_v26  ;;  %v621_v31 = vpack.c.bf16 %v214_v30, %v213_v29  ;;  %v216_v33 = vld [vmem:[#allocation6 + $0x78] sm:$0xff]  ;;  %v303_v35 = vld [vmem:[#allocation7] sm:$0xff]  ;;  %v304_v36 = vld [vmem:[#allocation7 + $0x8] sm:$0xff] }
  0x61   :  { %626 = vmatprep.subr.bf16.mxu0 %v795_v0  ;;  %607 = vmatpush3.bf16.msra.mxu1 %v606_v13  ;;  %v624_v34 = vpack.c.bf16 %v216_v33, %v215_v32  ;;  %v305_v37 = vld [vmem:[#allocation7 + $0x10] sm:$0xff]  ;;  %v627_v38 = vpack.c.bf16 %v304_v36, %v303_v35  ;;  %v306_v39 = vld [vmem:[#allocation7 + $0x18] sm:$0xff]  ;;  %v307_v41 = vld [vmem:[#allocation7 + $0x20] sm:$0xff] }
  0x62   :  { %608 = vmatprep.subr.bf16.mxu1 %v795_v0  ;;  %v630_v40 = vpack.c.bf16 %v306_v39, %v305_v37  ;;  %v308_v42 = vld [vmem:[#allocation7 + $0x28] sm:$0xff]  ;;  %v309_v44 = vld [vmem:[#allocation7 + $0x30] sm:$0xff]  ;;  %v310_v45 = vld [vmem:[#allocation7 + $0x38] sm:$0xff] }
  0x63   :  { %506 = vmatmul.mubr.msk.f32.vlgmr.msra.gmra.mrb[0].mxu0 %vm105_vm1, %v91_v16  ;;  %v633_v43 = vpack.c.bf16 %v308_v42, %v307_v41  ;;  %v636_v46 = vpack.c.bf16 %v310_v45, %v309_v44  ;;  %v311_v47 = vld [vmem:[#allocation7 + $0x40] sm:$0xff]  ;;  %v312_v48 = vld [vmem:[#allocation7 + $0x48] sm:$0xff]  ;;  %v313_v50 = vld [vmem:[#allocation7 + $0x50] sm:$0xff] }
  0x64   :  { %508 = vmatprep.mubr.msk.f32.mxu0 %vm796_vm0, %v797_v1  ;;  %628 = vmatpush3.bf16.msra.mxu0 %v627_v38  ;;  %v639_v49 = vpack.c.bf16 %v312_v48, %v311_v47  ;;  %v314_v51 = vld [vmem:[#allocation7 + $0x58] sm:$0xff]  ;;  %v315_v53 = vld [vmem:[#allocation7 + $0x60] sm:$0xff]  ;;  %v316_v54 = vld [vmem:[#allocation7 + $0x68] sm:$0xff] }
  0x65   :  { %610 = vmatpush3.bf16.msra.mxu1 %v609_v17  ;;  %629 = vmatprep.subr.bf16.mxu0 %v795_v0  ;;  %v642_v52 = vpack.c.bf16 %v314_v51, %v313_v50  ;;  %v645_v55 = vpack.c.bf16 %v316_v54, %v315_v53  ;;  %v448_v56 = vld [vmem:[%s975_s2] ss:$0 sm:$0xff]  ;;  %v317_v9 = vld [vmem:[#allocation7 + $0x70] sm:$0xff]  ;;  %v318_v10 = vld [vmem:[#allocation7 + $0x78] sm:$0xff] }
  0x66   :  { %611 = vmatprep.subr.bf16.mxu1 %v795_v0  ;;  %v648_v11 = vpack.c.bf16 %v318_v10, %v317_v9  ;;  %v321_v32 = vld [vmem:[#allocation9 + $0x10] sm:$0xff] }
  0x67   :  { %509 = vmatmul.mubr.msk.f32.gmra.mrb[2].mxu0 %vm105_vm1, %v92_v20 }
  0x68   :  { %511 = vmatprep.mubr.msk.f32.mxu0 %vm796_vm0, %v797_v1  ;;  %631 = vmatpush3.bf16.msra.mxu0 %v630_v40 }
  0x69   :  { %613 = vmatpush3.bf16.msra.mxu1 %v612_v21  ;;  %632 = vmatprep.subr.bf16.mxu0 %v795_v0 }
  0x6a   :  { %614 = vmatprep.subr.bf16.mxu1 %v795_v0 }
  0x6b   :  { %512 = vmatmul.mubr.msk.f32.gmra.mrb[4].mxu0 %vm105_vm1, %v93_v24  ;;  %v319_v24 = vld [vmem:[#allocation9] sm:$0xff] }
  0x6c   :  { %587 = vmatprep.mubr.msk.f32.mxu0 %vm796_vm0, %v797_v1  ;;  %634 = vmatpush3.bf16.msra.mxu0 %v633_v43 }
  0x6d   :  { %616 = vmatpush3.bf16.msra.mxu1 %v615_v25  ;;  %635 = vmatprep.subr.bf16.mxu0 %v795_v0 }
  0x6e   :  { %617 = vmatprep.subr.bf16.mxu1 %v795_v0 }
  0x70   :  { %637 = vmatpush3.bf16.msra.mxu0 %v636_v46 }
  0x71   :  { %619 = vmatpush3.bf16.msra.mxu1 %v618_v28  ;;  %638 = vmatprep.subr.bf16.mxu0 %v795_v0  ;;  %v320_v28 = vld [vmem:[#allocation9 + $0x8] sm:$0xff] }
  0x72   :  { %620 = vmatprep.subr.bf16.mxu1 %v795_v0 }
  0x74   :  { %640 = vmatpush3.bf16.msra.mxu0 %v639_v49 }
  0x75   :  { %622 = vmatpush3.bf16.msra.mxu1 %v621_v31  ;;  %641 = vmatprep.subr.bf16.mxu0 %v795_v0 }
  0x76   :  { %623 = vmatprep.subr.bf16.mxu1 %v795_v0 }
  0x78   :  { %643 = vmatpush3.bf16.msra.mxu0 %v642_v52 }
  0x79   :  { %625 = vmatpush3.bf16.msra.mxu1 %v624_v34  ;;  %644 = vmatprep.subr.bf16.mxu0 %v795_v0 }
  0x7c   :  { %646 = vmatpush3.bf16.msra.mxu0 %v645_v55 }
  0x7d   :  { %647 = vmatprep.subr.bf16.mxu0 %v795_v0 }
  0x80   :  { %649 = vmatpush3.bf16.msra.mxu0 %v648_v11 }
 0x136   :  { %v181_v57 = vpop.f32.mrb[0].mxu0 }
 0x137   :  { %v182_v58 = vadd.f32 %v448_v56, %v181_v57  ;;  %v507_v59 = vpop.f32.mrb[1].mxu0 }
 0x139   :  { %v195_v60 = vmax.f32 %v182_v58, 0.0 }
 0x13a   :  { %v186_v61 = vpop.f32.mrb[2].mxu0 }
 0x13b   :  { %v198_v62 = vmin.f32 %v195_v60, 1e+20  ;;  %v187_v63 = vadd.f32 %v448_v56, %v186_v61  ;;  %v510_v2 = vpop.f32.mrb[3].mxu0 }
 0x13d   :  { %v196_v3 = vmax.f32 %v187_v63, 0.0  ;;  %547 = vmatmul.mubr.f32.vlgmr.msra.gmra.mrb[0].mxu1 %v198_v62 }
 0x13e   :  { %v191_v4 = vpop.f32.mrb[4].mxu0  ;;  %549 = vmatprep.mubr.msk.f32.mxu1 %vm796_vm0, %v797_v1 }
 0x13f   :  { %v199_v5 = vmin.f32 %v196_v3, 1e+20  ;;  %v192_v0 = vadd.f32 %v448_v56, %v191_v4  ;;  %v513_v6 = vpop.f32.mrb[5].mxu0 }
 0x141   :  { %v197_v7 = vmax.f32 %v192_v0, 0.0  ;;  %550 = vmatmul.mubr.f32.gmra.mrb[2].mxu1 %v199_v5 }
 0x142   :  { %552 = vmatprep.mubr.msk.f32.mxu1 %vm796_vm0, %v797_v1 }
 0x143   :  { %v200_v8 = vmin.f32 %v197_v7, 1e+20 }
 0x145   :  { %553 = vmatmul.mubr.f32.gmra.mrb[4].mxu1 %v200_v8 }
 0x210   :  { %v283_v12 = vpop.f32.mrb[0].mxu1 }
 0x211   :  { %v297_v13 = vmax.f32 %v283_v12, 0.0  ;;  %v548_v14 = vpop.f32.mrb[1].mxu1 }
 0x213   :  { %v300_v15 = vmin.f32 %v297_v13, 1e+20 }
 0x214   :  { %v288_v16 = vpop.f32.mrb[2].mxu1 }
 0x215   :  { %v298_v17 = vmax.f32 %v288_v16, 0.0  ;;  %v551_v18 = vpop.f32.mrb[3].mxu1  ;;  %588 = vmatmul.mubr.f32.vlgmr.msra.gmra.mrb[6].mxu0 %v300_v15 }
 0x216   :  { %590 = vmatprep.mubr.msk.f32.mxu0 %vm796_vm0, %v797_v1 }
 0x217   :  { %v301_v19 = vmin.f32 %v298_v17, 1e+20 }
 0x218   :  { %v293_v20 = vpop.f32.mrb[4].mxu1 }
 0x219   :  { %v299_v21 = vmax.f32 %v293_v20, 0.0  ;;  %v554_v22 = vpop.f32.mrb[5].mxu1  ;;  %591 = vmatmul.mubr.f32.gmra.mrb[8].mxu0 %v301_v19 }
 0x21a   :  { %593 = vmatprep.mubr.msk.f32.mxu0 %vm796_vm0, %v797_v1 }
 0x21b   :  { %v302_v23 = vmin.f32 %v299_v21, 1e+20 }
 0x21d   :  { %594 = vmatmul.mubr.f32.gmra.mrb[10].mxu0 %v302_v23 }
 0x2e8   :  { %v388_v25 = vpop.f32.mrb[6].mxu0 }
 0x2e9   :  { %v389_v26 = vadd.f32 %v388_v25, %v319_v24  ;;  %v589_v27 = vpop.f32.mrb[7].mxu0 }
 0x2eb   :  { %402 = vmax.xlane.f32.xlu0 %v389_v26 }
 0x2ec   :  { %v393_v29 = vpop.f32.mrb[8].mxu0 }
 0x2ed   :  { %v394_v30 = vadd.f32 %v393_v29, %v320_v28  ;;  %v592_v31 = vpop.f32.mrb[9].mxu0 }
 0x2ef   :  { %404 = vmax.xlane.f32.xlu0 %v394_v30 }
 0x2f0   :  { %v398_v33 = vpop.f32.mrb[10].mxu0 }
 0x2f1   :  { %v399_v34 = vadd.f32 %v398_v33, %v321_v32  ;;  %v595_v35 = vpop.f32.mrb[11].mxu0 }
 0x2f3   :  { %406 = vmax.xlane.f32.xlu1 %v399_v34 }
 0x378   :  { %v403_v36 = vpop.xlane.xlu0 %402 }
 0x379   :  { %v408_v37 = vsub.f32 %v389_v26, %v403_v36 }
 0x37b   :  { %v411_v1 = vmul.f32 1.442695, %v408_v37 }
 0x37c   :  { %v405_v38 = vpop.xlane.xlu0 %404 }
 0x37d   :  { %660 = vpow2.f32 %v411_v1  ;;  %v409_v39 = vsub.f32 %v394_v30, %v405_v38 }
 0x37f   :  { %v413_v40 = vmul.f32 1.442695, %v409_v39 }
 0x380   :  { %v407_v41 = vpop.xlane.xlu1 %406 }
 0x381   :  { %662 = vpow2.f32 %v413_v40  ;;  %v410_v42 = vsub.f32 %v399_v34, %v407_v41 }
 0x383   :  { %v415_v43 = vmul.f32 1.442695, %v410_v42 }
 0x385   :  { %664 = vpow2.f32 %v415_v43 }
 0x387   :  { %v661_v44 = vpop.eup %660 }
 0x388   :  { %417 = vadd.xlane.f32.xlu1 %v661_v44 }
 0x38b   :  { %v663_v45 = vpop.eup %662 }
 0x38c   :  { %419 = vadd.xlane.f32.xlu0 %v663_v45 }
 0x38f   :  { %v665_v46 = vpop.eup %664 }
 0x390   :  { %421 = vadd.xlane.f32.xlu1 %v665_v46 }
 0x415   :  { %v418_v47 = vpop.xlane.xlu1 %417 }
 0x416   :  { %666 = vrcp.f32 %v418_v47 }
 0x419   :  { %v420_v48 = vpop.xlane.xlu0 %419 }
 0x41a   :  { %668 = vrcp.f32 %v420_v48 }
 0x41d   :  { %v422_v49 = vpop.xlane.xlu1 %421 }
 0x41e   :  { %670 = vrcp.f32 %v422_v49 }
 0x420   :  { %v667_v50 = vpop.eup %666 }
 0x421   :  { %v426_v51 = vmul.f32 %v667_v50, %v418_v47 }
 0x423   :  { %v429_v52 = vsub.f32 2.0, %v426_v51 }
 0x424   :  { %v669_v53 = vpop.eup %668 }
 0x425   :  { %v432_v54 = vmul.f32 %v667_v50, %v429_v52  ;;  %v427_v55 = vmul.f32 %v669_v53, %v420_v48 }
 0x427   :  { %v435_v56 = vmul.f32 %v661_v44, %v432_v54  ;;  %v430_v57 = vsub.f32 2.0, %v427_v55 }
 0x428   :  { %v671_v58 = vpop.eup %670 }
 0x429   :  { %438 = vst [vmem:[%s979_s6] sm:$0xff] %v435_v56  ;;  %v433_v59 = vmul.f32 %v669_v53, %v430_v57  ;;  %v428_v60 = vmul.f32 %v671_v58, %v422_v49 }
 0x42b   :  { %v436_v61 = vmul.f32 %v663_v45, %v433_v59  ;;  %v431_v62 = vsub.f32 2.0, %v428_v60 }
 0x42d   :  { %439 = vst [vmem:[%s979_s6 + $0x8] sm:$0xff] %v436_v61  ;;  %v434_v63 = vmul.f32 %v671_v58, %v431_v62 }
 0x42f   :  { %v437_v2 = vmul.f32 %v665_v46, %v434_v63 }
 0x431   :  { %440 = vst [vmem:[%s979_s6 + $0x10] sm:$0xff] %v437_v2 }
 0x432   :  { %445 = vsyncpa [#allocation3], 1 }
 0x433   :  { %446 = vsyncpa [#allocation5], 1 }
 0x434   :  { %447 = vsyncpa [#allocation8], 1 }

</bundles_post_ra>
